<compile_context>
chip_gen: v7x
topology: tpu7x:2x2x1
jax: 0.10.0
libtpu: 0.0.40
codegen_flags: <defaults>
</compile_context>

<pallas_src>
import functools

import jax
import jax.numpy as jnp
from jax.experimental import pallas as pl
from jax.experimental.pallas import tpu as pltpu


def _banded_conv_weights(weight_oihw, W, L_pad, dtype):
    """Repack (Cout, Cin, 3, 3) conv weights into 3 banded (L_pad, L_pad) matrices.

    M[dh][wi*Cin + ci, wo*Cout + co] = weight[co, ci, dh, wi - wo + 1] if |wi - wo| <= 1
    else 0.  Multiplying the lane-dense (rows, W*Cin) activation slab by M[dh] performs,
    for kernel row dh, both the W-shift (implicit zero padding at the W borders via band
    truncation) and the input-channel contraction on the MXU.  Rows/cols >= W*C are zero
    padding up to the 128-lane-aligned L_pad.
    """
    C_out, C_in, KH, KW = weight_oihw.shape
    w_hwio = jnp.transpose(weight_oihw, (2, 3, 1, 0))            # (KH, KW, Cin, Cout)
    wi = jnp.arange(W)[:, None]
    wo = jnp.arange(W)[None, :]
    dw = wi - wo + 1                                             # (W, W)
    band = (dw >= 0) & (dw <= KW - 1)
    g = w_hwio[:, jnp.clip(dw, 0, KW - 1)]                       # (KH, W, W, Cin, Cout)
    g = g * band[None, :, :, None, None].astype(w_hwio.dtype)
    g = jnp.transpose(g, (0, 1, 3, 2, 4))                        # (KH, wi, Cin, wo, Cout)
    g = g.reshape(KH, W * C_in, W * C_out)
    g = jnp.pad(g, ((0, 0), (0, L_pad - W * C_in), (0, L_pad - W * C_out)))
    return g.astype(dtype)                                       # (3, L_pad, L_pad)


def _shortcut_kernel(x_ref, w_ref, b_ref, o_ref):
    # x_ref: (H, Lp)     lane-dense slab of ONE image (rows = H, lanes = W*C, 128-padded).
    # w_ref: (3, Lp, Lp) banded weight matrices (one per kernel row dh), grid-resident.
    # b_ref: (1, Lp)     f32 bias tiled across W (zero in the lane padding).
    # o_ref: (H, Lp)     output = x + conv3x3(x) + bias (lane padding stays zero).
    H, _ = x_ref.shape
    x = x_ref[...]                                               # also the residual

    # H halo: XLU sublane rotations (no sliced-concatenate VMEM copies).  The rows where
    # the rotation wraps around are exactly the image-boundary rows zeroed just below.
    x_hm1 = pltpu.roll(x, shift=1, axis=0)                       # row h <- row h-1
    x_hp1 = pltpu.roll(x, shift=H - 1, axis=0)                   # row h <- row h+1
    r = jax.lax.broadcasted_iota(jnp.int32, (H, 1), 0)           # (H,1) mask column only
    x_hm1 = jnp.where(r == 0, 0.0, x_hm1)
    x_hp1 = jnp.where(r == H - 1, 0.0, x_hp1)

    # 3x3 conv = 3 banded MXU matmuls (dh = 0, 1, 2).  Operands in the compute dtype
    # (bf16 by default -> native MXU path); chained f32 accumulation (MRB-friendly).
    cd = w_ref.dtype
    acc = jnp.dot(x.astype(cd), w_ref[1], preferred_element_type=jnp.float32)
    acc += jnp.dot(x_hm1.astype(cd), w_ref[0], preferred_element_type=jnp.float32)
    acc += jnp.dot(x_hp1.astype(cd), w_ref[2], preferred_element_type=jnp.float32)

    # ShortcutBlock: output = x + sub(x).  Residual + bias + cast stay f32 on the VPU.
    y = x.astype(jnp.float32) + acc + b_ref[...]
    o_ref[...] = y.astype(o_ref.dtype)


def _vmem_limit_bytes(per_step_bytes, resident_bytes):
    """Scoped-VMEM budget from actual footprints (+ double-buffering + headroom), capped
    against the device VMEM capacity (64 MiB/TC on v7x, 128 MiB on v5e/v6e)."""
    need = 2 * per_step_bytes + 2 * resident_bytes + (2 << 20)
    try:
        cap = pltpu.get_tpu_info().vmem_capacity_bytes
    except Exception:                                            # conservative fallback
        cap = 64 * 1024 * 1024                                   # v7x per-TC (smallest)
    return int(min(max(need, 8 * 1024 * 1024), (cap * 3) // 4))


def shortcut_block_forward(x_nchw, weight_oihw, bias, *, compute_dtype=jnp.bfloat16):
    """ShortcutBlock forward with sub = conv3x3.  x_nchw: (N, C, H, W) -> (N, C, H, W)."""
    N, C, H, W = x_nchw.shape
    if H % 8 != 0:
        raise NotImplementedError("per-image row blocks require H % 8 == 0")
    L = W * C
    Lp = ((L + 127) // 128) * 128                                # lane axis -> full vregs
    R = N * H

    # Layout glue (PyTorch NCHW adapter): NHWC, then a lane-dense (N*H, W*C) slab,
    # zero-padded on the lane axis to a multiple of 128.
    # TODO(synk): in an NHWC end-to-end pipeline these transposes (and the inverse below)
    # disappear; at realistic sizes they are the dominant extra HBM traffic.
    x_flat = jnp.transpose(x_nchw, (0, 2, 3, 1)).reshape(R, L)
    x_flat = jnp.pad(x_flat, ((0, 0), (0, Lp - L)))
    w_banded = _banded_conv_weights(weight_oihw, W, Lp, compute_dtype)   # one-time repack
    b_flat = jnp.pad(jnp.tile(bias, W), (0, Lp - L)).reshape(1, Lp).astype(jnp.float32)

    per_step_bytes = 2 * H * Lp * x_flat.dtype.itemsize          # in + out block
    resident_bytes = (w_banded.size * w_banded.dtype.itemsize
                      + b_flat.size * b_flat.dtype.itemsize)

    out_flat = pl.pallas_call(
        _shortcut_kernel,
        out_shape=jax.ShapeDtypeStruct((R, Lp), x_nchw.dtype),
        grid_spec=pltpu.PrefetchScalarGridSpec(
            num_scalar_prefetch=0,
            grid=(N,),                                           # one image per step
            in_specs=[
                pl.BlockSpec((H, Lp), lambda n: (n, 0)),         # pipelined activations
                pl.BlockSpec((3, Lp, Lp), lambda n: (0, 0, 0)),  # resident weights
                pl.BlockSpec((1, Lp), lambda n: (0, 0)),         # resident bias
            ],
            out_specs=pl.BlockSpec((H, Lp), lambda n: (n, 0)),
        ),
        input_output_aliases={0: 0},                             # output reuses x slab
        compiler_params=pltpu.CompilerParams(
            dimension_semantics=("parallel",),                   # shards v7x's 2 TCs
            vmem_limit_bytes=_vmem_limit_bytes(per_step_bytes, resident_bytes),
        ),
    )(x_flat, w_banded, b_flat)

    out = out_flat[:, :L].reshape(N, H, W, C)
    return jnp.transpose(out, (0, 3, 1, 2))                      # back to NCHW


def shortcut_reference(x_nchw, weight_oihw, bias):
    """Pure-JAX reference: x + (conv3x3(x) + bias)."""
    conv = jax.lax.conv_general_dilated(
        x_nchw, weight_oihw,
        window_strides=(1, 1), padding=((1, 1), (1, 1)),
        dimension_numbers=("NCHW", "OIHW", "NCHW"),
        precision=jax.lax.Precision.HIGHEST,
    ) + bias.reshape(1, -1, 1, 1)
    return x_nchw + conv


if __name__ == "__main__":
    # Small shapes consistent with the module: batch=2, nf=4, spatial=16.
    N, C, H, W = 2, 4, 16, 16
    key = jax.random.PRNGKey(0)
    kx, kw, kb = jax.random.split(key, 3)

    x = jax.random.normal(kx, (N, C, H, W), dtype=jnp.float32)
    weight = 0.1 * jax.random.normal(kw, (C, C, 3, 3), dtype=jnp.float32)   # OIHW
    bias = 0.05 * jax.random.normal(kb, (C,), dtype=jnp.float32)

    ref = shortcut_reference(x, weight, bias)

    # Default (performance) path: bf16 MXU operands, f32 accumulation/residual/bias.
    fwd = jax.jit(shortcut_block_forward)
    out = jax.block_until_ready(fwd(x, weight, bias))
    assert out.shape == (N, C, H, W)
    # Tolerance sized for bf16 MXU operands; a structural bug (e.g. swapped halo rows)
    # would produce O(0.1..1) errors, far above this.
    assert jnp.allclose(out, ref, atol=3e-2, rtol=3e-2), "mismatch vs reference (bf16)"

    # f32-operand path for a tight numerical check of the kernel structure.
    fwd_f32 = jax.jit(functools.partial(shortcut_block_forward,
                                        compute_dtype=jnp.float32))
    out_f32 = jax.block_until_ready(fwd_f32(x, weight, bias))
    assert jnp.allclose(out_f32, ref, atol=1e-4, rtol=1e-4), "mismatch vs reference (f32)"

    print("KERNEL_OK")
</pallas_src>

<mosaic_0001>
module attributes {stable_mosaic.version = 11 : i64} {
  func.func @_shortcut_kernel(%arg0: i32, %arg1: memref<16x128xf32, #tpu.memory_space<vmem>>, %arg2: memref<3x128x128xbf16, #tpu.memory_space<vmem>>, %arg3: memref<1x128xf32, #tpu.memory_space<vmem>>, %arg4: memref<16x128xf32, #tpu.memory_space<vmem>>) attributes {dimension_semantics = [#tpu.dimension_semantics<parallel>], iteration_bounds = array<i64: 2>, scalar_prefetch = 0 : i64, scratch_operands = 0 : i64, tpu.core_type = #tpu.core_type<tc>, window_params = [{transform_indices = @transform_0, window_bounds = array<i64: 16, 128>}, {pipeline_mode = #tpu.pipeline_mode<synchronous>, transform_indices = @transform_1, window_bounds = array<i64: 3, 128, 128>}, {pipeline_mode = #tpu.pipeline_mode<synchronous>, transform_indices = @transform_2, window_bounds = array<i64: 1, 128>}, {transform_indices = @transform_3, window_bounds = array<i64: 16, 128>}]} {
    %c0 = arith.constant 0 : index
    %c0_0 = arith.constant 0 : index
    %0 = vector.load %arg1[%c0, %c0_0] : memref<16x128xf32, #tpu.memory_space<vmem>>, vector<16x128xf32>
    %c1_i32 = arith.constant 1 : i32
    %1 = tpu.dynamic_rotate %0 by %c1_i32 dim 0 : vector<16x128xf32>, i32 -> vector<16x128xf32>
    %c15_i32 = arith.constant 15 : i32
    %2 = tpu.dynamic_rotate %0 by %c15_i32 dim 0 : vector<16x128xf32>, i32 -> vector<16x128xf32>
    %3 = tpu.iota {dimensions = array<i32: 0>} : vector<16x1xi32>
    %c0_i32 = arith.constant 0 : i32
    %4 = vector.broadcast %c0_i32 : i32 to vector<16x1xi32>
    %5 = arith.cmpi eq, %3, %4 : vector<16x1xi32>
    %cst = arith.constant 0.000000e+00 : f32
    %6 = vector.shape_cast %5 : vector<16x1xi1> to vector<16x1xi1>
    %7 = vector.broadcast %6 : vector<16x1xi1> to vector<16x128xi1>
    %8 = vector.broadcast %cst : f32 to vector<16x128xf32>
    %9 = arith.select %7, %8, %1 : vector<16x128xi1>, vector<16x128xf32>
    %c15_i32_1 = arith.constant 15 : i32
    %10 = vector.broadcast %c15_i32_1 : i32 to vector<16x1xi32>
    %11 = arith.cmpi eq, %3, %10 : vector<16x1xi32>
    %cst_2 = arith.constant 0.000000e+00 : f32
    %12 = vector.shape_cast %11 : vector<16x1xi1> to vector<16x1xi1>
    %13 = vector.broadcast %12 : vector<16x1xi1> to vector<16x128xi1>
    %14 = vector.broadcast %cst_2 : f32 to vector<16x128xf32>
    %15 = arith.select %13, %14, %2 : vector<16x128xi1>, vector<16x128xf32>
    %16 = arith.truncf %0 : vector<16x128xf32> to vector<16x128xbf16>
    %c1 = arith.constant 1 : index
    %c0_3 = arith.constant 0 : index
    %c0_4 = arith.constant 0 : index
    %17 = vector.load %arg2[%c1, %c0_3, %c0_4] : memref<3x128x128xbf16, #tpu.memory_space<vmem>>, vector<1x128x128xbf16>
    %18 = vector.shape_cast %17 : vector<1x128x128xbf16> to vector<128x128xbf16>
    %cst_5 = arith.constant dense<0.000000e+00> : vector<16x128xf32>
    %19 = tpu.matmul %16, %18, %cst_5 {dimension_numbers = #tpu.dot_dimension_numbers<[1], [0], [0], [1], [0, 0, 1, 1], [], []>} : vector<16x128xbf16>, vector<128x128xbf16>, vector<16x128xf32> -> vector<16x128xf32>
    %20 = arith.truncf %9 : vector<16x128xf32> to vector<16x128xbf16>
    %c0_6 = arith.constant 0 : index
    %c0_7 = arith.constant 0 : index
    %c0_8 = arith.constant 0 : index
    %21 = vector.load %arg2[%c0_6, %c0_7, %c0_8] : memref<3x128x128xbf16, #tpu.memory_space<vmem>>, vector<1x128x128xbf16>
    %22 = vector.shape_cast %21 : vector<1x128x128xbf16> to vector<128x128xbf16>
    %cst_9 = arith.constant dense<0.000000e+00> : vector<16x128xf32>
    %23 = tpu.matmul %20, %22, %cst_9 {dimension_numbers = #tpu.dot_dimension_numbers<[1], [0], [0], [1], [0, 0, 1, 1], [], []>} : vector<16x128xbf16>, vector<128x128xbf16>, vector<16x128xf32> -> vector<16x128xf32>
    %24 = arith.addf %19, %23 : vector<16x128xf32>
    %25 = arith.truncf %15 : vector<16x128xf32> to vector<16x128xbf16>
    %c2 = arith.constant 2 : index
    %c0_10 = arith.constant 0 : index
    %c0_11 = arith.constant 0 : index
    %26 = vector.load %arg2[%c2, %c0_10, %c0_11] : memref<3x128x128xbf16, #tpu.memory_space<vmem>>, vector<1x128x128xbf16>
    %27 = vector.shape_cast %26 : vector<1x128x128xbf16> to vector<128x128xbf16>
    %cst_12 = arith.constant dense<0.000000e+00> : vector<16x128xf32>
    %28 = tpu.matmul %25, %27, %cst_12 {dimension_numbers = #tpu.dot_dimension_numbers<[1], [0], [0], [1], [0, 0, 1, 1], [], []>} : vector<16x128xbf16>, vector<128x128xbf16>, vector<16x128xf32> -> vector<16x128xf32>
    %29 = arith.addf %24, %28 : vector<16x128xf32>
    %30 = arith.addf %0, %29 : vector<16x128xf32>
    %c0_13 = arith.constant 0 : index
    %c0_14 = arith.constant 0 : index
    %31 = vector.load %arg3[%c0_13, %c0_14] : memref<1x128xf32, #tpu.memory_space<vmem>>, vector<1x128xf32>
    %32 = vector.broadcast %31 : vector<1x128xf32> to vector<16x128xf32>
    %33 = arith.addf %30, %32 : vector<16x128xf32>
    %c0_15 = arith.constant 0 : index
    %c0_16 = arith.constant 0 : index
    %34 = vector.load %arg4[%c0_15, %c0_16] : memref<16x128xf32, #tpu.memory_space<vmem>>, vector<16x128xf32>
    tpu.vector_store %arg4[%c0_15, %c0_16], %33 {strides = array<i32>} : memref<16x128xf32, #tpu.memory_space<vmem>>, vector<16x128xf32>,
    return
  }
  func.func @transform_0(%arg0: i32) -> (i32, i32) {
    %c0_i32 = arith.constant 0 : i32
    %c0_i32_0 = arith.constant 0 : i32
    return %arg0, %c0_i32 : i32, i32
  }
  func.func @transform_1(%arg0: i32) -> (i32, i32, i32) {
    %c0_i32 = arith.constant 0 : i32
    %c0_i32_0 = arith.constant 0 : i32
    %c0_i32_1 = arith.constant 0 : i32
    %c0_i32_2 = arith.constant 0 : i32
    return %c0_i32, %c0_i32_0, %c0_i32_1 : i32, i32, i32
  }
  func.func @transform_2(%arg0: i32) -> (i32, i32) {
    %c0_i32 = arith.constant 0 : i32
    %c0_i32_0 = arith.constant 0 : i32
    %c0_i32_1 = arith.constant 0 : i32
    return %c0_i32, %c0_i32_0 : i32, i32
  }
  func.func @transform_3(%arg0: i32) -> (i32, i32) {
    %c0_i32 = arith.constant 0 : i32
    %c0_i32_0 = arith.constant 0 : i32
    return %arg0, %c0_i32 : i32, i32
  }
}

</mosaic_0001>

<bundles_post_ra>
// kernel: tile.8
= control target key start
LH: loop header
LB: loop body
LE: loop exit
PB: predicated region body
PF: predicated region fallthrough
CT: control target
= control target key end

     0   :  { %s28_s0 = inlined_call_operand.vmem [shape: f32[4], index: 0, kind: input, shape index: {}]   ;;  %s29_s1 = inlined_call_operand.vmem [shape: f32[16,4], index: 1, kind: output, shape index: {}]  }
   0x1   :  { %v4_v0 = vld [vmem:[%s28_s0] ss:$0 sm:$0xff] }
   0x2   :  { %5 = vst [vmem:[%s29_s1] sm:$0xff] %v4_v0  ;;  %8 = vst [vmem:[%s29_s1 + $0x8] sm:$0xff] %v4_v0 }

// kernel: tile.9
= control target key start
LH: loop header
LB: loop body
LE: loop exit
PB: predicated region body
PF: predicated region fallthrough
CT: control target
= control target key end

     0   :  { %s131_s10 = smov 60   ;;  %s132_s11 = smov 52   ;;  %vm3_vm0 = vcmask 31744   ;;  %vm9_vm1 = vcmask 523744   ;;  %vm15_vm2 = vcmask 490944   ;;  %vm21_vm3 = vcmask 458144   ;;  %s207_s0 = inlined_call_operand.vmem [shape: f32[16,4], index: 0, kind: input, shape index: {}]   ;;  %s208_s1 = inlined_call_operand.vmem [shape: f32[64], index: 1, kind: output, shape index: {}]  }
   0x1   :  { %v101_v0 = vld [vmem:[%s207_s0 + $0xf] sm:$0x1]   ;;  %v103_v1 = vld [vmem:[%s207_s0 + $0xd] sm:$0x1]   ;;  %v102_v2 = vld [vmem:[%s207_s0 + $0xe] sm:$0x1]  }
   0x2   :  { %7 = vrot.lane.b32.xlu0 %v101_v0, %s131_s10  ;;  %19 = vrot.lane.b32.xlu1 %v103_v1, %s132_s11  ;;  %v104_v3 = vld [vmem:[%s207_s0 + $0xc] sm:$0x1]   ;;  %s133_s16 = smov 56   ;;  %s134_s17 = smov 48   ;;  %v105_v4 = vld [vmem:[%s207_s0 + $0xb] sm:$0x1]  }
   0x3   :  { %v106_v5 = vld [vmem:[%s207_s0 + $0xa] sm:$0x1]   ;;  %v2_v6 = vld [vmem:[%s207_s0] sm:$0x1]   ;;  %s135_s24 = smov 44   ;;  %s136_s25 = smov 40  }
   0x4   :  { %4 = vst.msk [vmem:[#allocation0] sm:$0x1] %vm3_vm0, %v2_v6   ;;  %v107_v7 = vld [vmem:[%s207_s0 + $0x9] sm:$0x1]   ;;  %v108_v8 = vld [vmem:[%s207_s0 + $0x8] sm:$0x1]  }
   0x5   :  { %s137_s30 = smov 36   ;;  %s138_s2 = smov 32   ;;  %v109_v9 = vld [vmem:[%s207_s0 + $0x7] sm:$0x1]   ;;  %v110_v10 = vld [vmem:[%s207_s0 + $0x6] sm:$0x1]  }
   0x6   :  { %13 = vrot.lane.b32.xlu0 %v102_v2, %s133_s16  ;;  %25 = vrot.lane.b32.xlu1 %v104_v3, %s134_s17  ;;  %s139_s7 = smov 28   ;;  %s140_s8 = smov 24   ;;  %v111_v11 = vld [vmem:[%s207_s0 + $0x5] sm:$0x1]   ;;  %v112_v12 = vld [vmem:[%s207_s0 + $0x4] sm:$0x1]  }
   0x7   :  { %s141_s13 = smov 20   ;;  %s142_s14 = smov 16   ;;  %v113_v13 = vld [vmem:[%s207_s0 + $0x3] sm:$0x1]   ;;  %v114_v14 = vld [vmem:[%s207_s0 + $0x2] sm:$0x1]  }
   0x8   :  { %s143_s19 = smov 12   ;;  %s144_s20 = smov 8   ;;  %v115_v15 = vld [vmem:[%s207_s0 + $0x1] sm:$0x1]   ;;  %vm27_vm4 = vcmask 425344   ;;  %vm33_vm5 = vcmask 392544  }
   0x9   :  { %s145_s0 = smov 4   ;;  %vm39_vm6 = vcmask 359744   ;;  %vm45_vm7 = vcmask 326944   ;;  %vm51_vm8 = vcmask 294144   ;;  %vm57_vm9 = vcmask 261344  }
   0xa   :  { %31 = vrot.lane.b32.xlu0 %v105_v4, %s135_s24  ;;  %37 = vrot.lane.b32.xlu1 %v106_v5, %s136_s25  ;;  %vm63_vm10 = vcmask 228544   ;;  %vm69_vm11 = vcmask 195744   ;;  %vm75_vm12 = vcmask 162944   ;;  %vm81_vm13 = vcmask 130144  }
   0xb   :  { %vm87_vm14 = vcmask 97344   ;;  %vm93_vm15 = vcmask 64544  }
   0xe   :  { %43 = vrot.lane.b32.xlu0 %v107_v7, %s137_s30  ;;  %49 = vrot.lane.b32.xlu1 %v108_v8, %s138_s2 }
  0x12   :  { %55 = vrot.lane.b32.xlu0 %v109_v9, %s139_s7  ;;  %61 = vrot.lane.b32.xlu1 %v110_v10, %s140_s8 }
  0x16   :  { %67 = vrot.lane.b32.xlu0 %v111_v11, %s141_s13  ;;  %73 = vrot.lane.b32.xlu1 %v112_v12, %s142_s14 }
  0x1a   :  { %79 = vrot.lane.b32.xlu0 %v113_v13, %s143_s19  ;;  %85 = vrot.lane.b32.xlu1 %v114_v14, %s144_s20 }
  0x1e   :  { %91 = vrot.lane.b32.xlu0 %v115_v15, %s145_s0 }
  0x74   :  { %v8_v16 = vpop.permute.xlu0 %7   ;;  %v20_v17 = vpop.permute.xlu1 %19  }
  0x75   :  { %10 = vst.msk [vmem:[#allocation0] sm:$0x1] %vm9_vm1, %v8_v16  }
  0x78   :  { %v14_v18 = vpop.permute.xlu0 %13   ;;  %v26_v19 = vpop.permute.xlu1 %25  }
  0x79   :  { %16 = vst.msk [vmem:[#allocation0] sm:$0x1] %vm15_vm2, %v14_v18  }
  0x7a   :  { %22 = vst.msk [vmem:[#allocation0] sm:$0x1] %vm21_vm3, %v20_v17  }
  0x7b   :  { %28 = vst.msk [vmem:[#allocation0] sm:$0x1] %vm27_vm4, %v26_v19  }
  0x7c   :  { %v32_v20 = vpop.permute.xlu0 %31   ;;  %v38_v21 = vpop.permute.xlu1 %37  }
  0x7d   :  { %34 = vst.msk [vmem:[#allocation0] sm:$0x1] %vm33_vm5, %v32_v20  }
  0x7e   :  { %40 = vst.msk [vmem:[#allocation0] sm:$0x1] %vm39_vm6, %v38_v21  }
  0x80   :  { %v44_v22 = vpop.permute.xlu0 %43   ;;  %v50_v23 = vpop.permute.xlu1 %49  }
  0x81   :  { %46 = vst.msk [vmem:[#allocation0] sm:$0x1] %vm45_vm7, %v44_v22  }
  0x82   :  { %52 = vst.msk [vmem:[#allocation0] sm:$0x1] %vm51_vm8, %v50_v23  }
  0x84   :  { %v56_v24 = vpop.permute.xlu0 %55   ;;  %v62_v25 = vpop.permute.xlu1 %61  }
  0x85   :  { %58 = vst.msk [vmem:[#allocation0] sm:$0x1] %vm57_vm9, %v56_v24  }
  0x86   :  { %64 = vst.msk [vmem:[#allocation0] sm:$0x1] %vm63_vm10, %v62_v25  }
  0x88   :  { %v68_v26 = vpop.permute.xlu0 %67   ;;  %v74_v27 = vpop.permute.xlu1 %73  }
  0x89   :  { %70 = vst.msk [vmem:[#allocation0] sm:$0x1] %vm69_vm11, %v68_v26  }
  0x8a   :  { %76 = vst.msk [vmem:[#allocation0] sm:$0x1] %vm75_vm12, %v74_v27  }
  0x8c   :  { %v80_v28 = vpop.permute.xlu0 %79   ;;  %v86_v29 = vpop.permute.xlu1 %85  }
  0x8d   :  { %82 = vst.msk [vmem:[#allocation0] sm:$0x1] %vm81_vm13, %v80_v28  }
  0x8e   :  { %88 = vst.msk [vmem:[#allocation0] sm:$0x1] %vm87_vm14, %v86_v29  }
  0x90   :  { %v92_v30 = vpop.permute.xlu0 %91  }
  0x91   :  { %94 = vst.msk [vmem:[#allocation0] sm:$0x1] %vm93_vm15, %v92_v30  }
  0x98   :  { %v98_v31 = vld [vmem:[#allocation0] sm:$0x1] }
  0x99   :  { %100 = vst [vmem:[%s208_s1] sm:$0x1] %v98_v31 }

// kernel: shortcut_block_forward.1
= control target key start
LH: loop header
LB: loop body
LE: loop exit
PB: predicated region body
PF: predicated region fallthrough
CT: control target
= control target key end

     0   :  { %s828_s12 = smov 0   ;;  %s971_s0 = inlined_call_operand.vmem [shape: f32[32,128], index: 0, kind: input, shape index: {}, may-alias: {0,3}]   ;;  %s972_s1 = inlined_call_operand.vmem [shape: bf16[3,128,128], index: 1, kind: input, shape index: {}]   ;;  %s973_s2 = inlined_call_operand.vmem [shape: f32[1,128], index: 2, kind: input, shape index: {}]   ;;  %s974_s3 = inlined_call_operand.vmem [shape: f32[32,128], index: 3, kind: output, shape index: {}, may-alias: {0,3}]  }
   0x1 LB: > { %s597_s13 = sadd.s32 4294967295, %s803_s12   ;;  %p601_p0 = scmp.ge.s32.totalorder %s803_s12, 1  ;;  %s803_s12 = sphi %s828_s12, %s13_s12  }
   0x2   : > { %p138_p1 = scmp.lt.s32.totalorder %s803_s12, 3 }
   0x4   : > { %p139_p2 = pnand %p601_p0, %p138_p1 }
   0x5   : > { %v773_v0 = vld [vmem:[%s972_s1] sm:$0xff] (!%p139_p2)   ;;  %v805_v1 = vmov (!%p139_p2), 0.0   ;;  %v775_v3 = vld [vmem:[%s972_s1 + $0x8] sm:$0xff] (!%p139_p2)   ;;  %vm806_vm0 = vmmov (!%p139_p2), 0   ;;  %s602_s20 = sshll.u32 (!%p139_p2), %s597_s13, 1  ;;  %v777_v5 = vld [vmem:[%s972_s1 + $0x10] sm:$0xff] (!%p139_p2)   ;;  %v179_v11 = vlaneseq (!%p139_p2) }
   0x6   : > { %142 = sbr.rel (%p139_p2) target bundleno = 291 (0x123), region = 32  ;;  %702 = vmatprep.subr.bf16.mxu0 (!%p139_p2), %v805_v1  ;;  %722 = vmatprep.subr.bf16.mxu1 (!%p139_p2), %v805_v1  ;;  %v774_v2 = vld [vmem:[%s972_s1 + $0x40] sm:$0xff] (!%p139_p2)   ;;  %v776_v4 = vld [vmem:[%s972_s1 + $0x48] sm:$0xff] (!%p139_p2)   ;;  %p163_p3 = scmp.lt.s32.totalorder (!%p139_p2), %s602_s20, 3  ;;  %v778_v6 = vld [vmem:[%s972_s1 + $0x50] sm:$0xff] (!%p139_p2)   ;;  %vm807_vm3 = vmmov (!%p139_p2), 1  }
   0x7   : > { %703 = vmatpush3.bf16.msra.mxu0 (!%p139_p2), %v773_v0  ;;  %718 = vmatprep.mubr.msk.bf16.mxu0 (!%p139_p2), %vm806_vm0, %v805_v1  ;;  %v779_v7 = vld [vmem:[%s972_s1 + $0x18] sm:$0xff] (!%p139_p2)   ;;  %v781_v9 = vld [vmem:[%s972_s1 + $0x20] sm:$0xff] (!%p139_p2)   ;;  %v783_v12 = vld [vmem:[%s972_s1 + $0x28] sm:$0xff] (!%p139_p2)   ;;  %v180_v16 = vshrl.u32 (!%p139_p2), %v179_v11, 7 }
   0x8   : > { %723 = vmatpush3.bf16.msra.mxu1 (!%p139_p2), %v774_v2  ;;  %704 = vmatprep.subr.bf16.mxu0 (!%p139_p2), %v805_v1  ;;  %v780_v8 = vld [vmem:[%s972_s1 + $0x58] sm:$0xff] (!%p139_p2)   ;;  %v782_v10 = vld [vmem:[%s972_s1 + $0x60] sm:$0xff] (!%p139_p2)   ;;  %v784_v13 = vld [vmem:[%s972_s1 + $0x68] sm:$0xff] (!%p139_p2)  }
   0x9   : > { %724 = vmatprep.subr.bf16.mxu1 (!%p139_p2), %v805_v1  ;;  %738 = vmatprep.mubr.msk.bf16.mxu1 (!%p139_p2), %vm806_vm0, %v805_v1  ;;  %v785_v17 = vld [vmem:[%s972_s1 + $0x30] sm:$0xff] (!%p139_p2)   ;;  %vm181_vm1 = vcmp.lt.s32.totalorder (!%p139_p2), %v180_v16, 1  ;;  %v787_v21 = vld [vmem:[%s972_s1 + $0x38] sm:$0xff] (!%p139_p2)   ;;  %vm673_vm2 = vcmp.ne.s32.totalorder (!%p139_p2), %v180_v16, 0  ;;  %v789_v27 = vld [vmem:[%s972_s1 + $0x80] sm:$0xff] (!%p139_p2)   ;;  %v189_v36 = vadd.s32 (!%p139_p2), 8, %v180_v16 }
   0xa   : > { %v786_v20 = vld [vmem:[%s972_s1 + $0x70] sm:$0xff] (!%p139_p2)   ;;  %v788_v24 = vld [vmem:[%s972_s1 + $0x78] sm:$0xff] (!%p139_p2)   ;;  %vm631_vm4 = vmpackc.low (!%p139_p2), %vm807_vm3, %vm673_vm2  ;;  %vm186_vm5 = vcmp.lt.s32.totalorder (!%p139_p2), %v180_v16, 7 }
   0xb   : > { %705 = vmatpush3.bf16.msra.mxu0 (!%p139_p2), %v775_v3  ;;  %v790_v28 = vld [vmem:[%s972_s1 + $0x88] sm:$0xff] (!%p139_p2)   ;;  %v791_v29 = vld [vmem:[%s972_s1 + $0x90] sm:$0xff] (!%p139_p2)   ;;  %v792_v30 = vld [vmem:[%s972_s1 + $0x98] sm:$0xff] (!%p139_p2)   ;;  %vm674_vm6 = vcmp.ne.s32.totalorder (!%p139_p2), %v189_v36, 15 }
   0xc   : > { %725 = vmatpush3.bf16.msra.mxu1 (!%p139_p2), %v776_v4  ;;  %706 = vmatprep.subr.bf16.mxu0 (!%p139_p2), %v805_v1  ;;  %v793_v31 = vld [vmem:[%s972_s1 + $0xa0] sm:$0xff] (!%p139_p2)   ;;  %v794_v32 = vld [vmem:[%s972_s1 + $0xa8] sm:$0xff] (!%p139_p2)   ;;  %v795_v33 = vld [vmem:[%s972_s1 + $0xb0] sm:$0xff] (!%p139_p2)  }
   0xd   : > { %726 = vmatprep.subr.bf16.mxu1 %v805_v1  ;;  %s976_s20 = smov (!%p163_p3, %s602_s20), 3  ;;  %v796_v37 = vld [vmem:[%s972_s1 + $0xb8] sm:$0xff]   ;;  %vm667_vm7 = vmpackc.low %vm674_vm6, %vm807_vm3  ;;  %v670_v54 = vld [vmem:[%s973_s2] ss:$0 sm:$0xff] }
   0xe   : > { %s603_s4 = sshll.u32 %s976_s20, 3 }
   0xf   : > { %707 = vmatpush3.bf16.msra.mxu0 %v777_v5  ;;  %s166_s11 = scalar_lea.vmem %s971_s0, %s603_s4  ;;  %s172_s22 = scalar_lea.vmem %s974_s3, %s603_s4 }
  0x10   : > { %727 = vmatpush3.bf16.msra.mxu1 %v778_v6  ;;  %708 = vmatprep.subr.bf16.mxu0 %v805_v1  ;;  %v894_v14 = vld [vmem:[%s166_s11] sm:$0xff]  ;;  %v897_v15 = vld [vmem:[%s166_s11 + $0x8] sm:$0xff] }
  0x11   : > { %728 = vmatprep.subr.bf16.mxu1 %v805_v1  ;;  %v177_v18 = vrot.slane %v894_v14, 7  ;;  %v178_v19 = vrot.slane %v897_v15, 7  ;;  %v206_v26 = vpack.c.bf16 %v897_v15, %v894_v14  ;;  %v184_v34 = vrot.slane %v894_v14, 1 }
  0x12   : > { %v185_v35 = vrot.slane %v897_v15, 1 }
  0x13   : > { %709 = vmatpush3.bf16.msra.mxu0 %v779_v7  ;;  %v182_v22 = vsel %vm181_vm1, %v177_v18, %v178_v19  ;;  %v183_v23 = vsel %vm181_vm1, %v178_v19, %v177_v18 }
  0x14   : > { %729 = vmatpush3.bf16.msra.mxu1 %v780_v8  ;;  %710 = vmatprep.subr.bf16.mxu0 %v805_v1  ;;  %v632_v25 = vpack.c.bf16 %v182_v22, %v183_v23  ;;  %v187_v38 = vsel %vm186_vm5, %v184_v34, %v185_v35  ;;  %v188_v39 = vsel %vm186_vm5, %v185_v35, %v184_v34 }
  0x15   : > { %730 = vmatprep.subr.bf16.mxu1 %v805_v1  ;;  %v668_v40 = vpack.c.bf16 %v188_v39, %v187_v38 }
  0x17   : > { %711 = vmatpush3.bf16.msra.mxu0 %v781_v9 }
  0x18   : > { %731 = vmatpush3.bf16.msra.mxu1 %v782_v10  ;;  %712 = vmatprep.subr.bf16.mxu0 %v805_v1 }
  0x19   : > { %732 = vmatprep.subr.bf16.mxu1 %v805_v1 }
  0x1b   : > { %713 = vmatpush3.bf16.msra.mxu0 %v783_v12 }
  0x1c   : > { %733 = vmatpush3.bf16.msra.mxu1 %v784_v13  ;;  %714 = vmatprep.subr.bf16.mxu0 %v805_v1 }
  0x1d   : > { %734 = vmatprep.subr.bf16.mxu1 %v805_v1 }
  0x1f   : > { %715 = vmatpush3.bf16.msra.mxu0 %v785_v17 }
  0x20   : > { %735 = vmatpush3.bf16.msra.mxu1 %v786_v20  ;;  %716 = vmatprep.subr.bf16.mxu0 %v805_v1 }
  0x21   : > { %736 = vmatprep.subr.bf16.mxu1 %v805_v1 }
  0x23   : > { %717 = vmatpush3.bf16.msra.mxu0 %v787_v21 }
  0x24   : > { %737 = vmatpush3.bf16.msra.mxu1 %v788_v24  ;;  %742 = vmatprep.subr.bf16.mxu0 %v805_v1 }
  0x26   : > { %719 = vmatmul.mubr.msk.bf16.vlgmr.msra.gmra.mrb[0].mxu0 %vm631_vm4, %v632_v25 }
  0x27   : > { %739 = vmatmul.mubr.bf16.vlgmr.msra.gmra.mrb[0].mxu1 %v206_v26  ;;  %743 = vmatpush3.bf16.msra.mxu0 %v789_v27 }
  0x28   : > { %744 = vmatprep.subr.bf16.mxu0 %v805_v1  ;;  %758 = vmatprep.mubr.msk.bf16.mxu0 %vm806_vm0, %v805_v1 }
  0x2b   : > { %745 = vmatpush3.bf16.msra.mxu0 %v790_v28 }
  0x2c   : > { %746 = vmatprep.subr.bf16.mxu0 %v805_v1 }
  0x2f   : > { %747 = vmatpush3.bf16.msra.mxu0 %v791_v29 }
  0x30   : > { %748 = vmatprep.subr.bf16.mxu0 %v805_v1 }
  0x33   : > { %749 = vmatpush3.bf16.msra.mxu0 %v792_v30 }
  0x34   : > { %750 = vmatprep.subr.bf16.mxu0 %v805_v1 }
  0x37   : > { %751 = vmatpush3.bf16.msra.mxu0 %v793_v31 }
  0x38   : > { %752 = vmatprep.subr.bf16.mxu0 %v805_v1 }
  0x3b   : > { %753 = vmatpush3.bf16.msra.mxu0 %v794_v32 }
  0x3c   : > { %754 = vmatprep.subr.bf16.mxu0 %v805_v1 }
  0x3f   : > { %755 = vmatpush3.bf16.msra.mxu0 %v795_v33 }
  0x40   : > { %756 = vmatprep.subr.bf16.mxu0 %v805_v1 }
  0x43   : > { %757 = vmatpush3.bf16.msra.mxu0 %v796_v37 }
  0x46   : > { %759 = vmatmul.mubr.msk.bf16.vlgmr.msra.gmra.mrb[4].mxu0 %vm667_vm7, %v668_v40 }
  0xf9   : > { %v323_v41 = vpop.f32.mrb[0].mxu0 }
  0xfa   : > { %v412_v42 = vpop.f32.mrb[0].mxu1  ;;  %v720_v43 = vpop.f32.mrb[1].mxu0 }
  0xfb   : > { %v413_v44 = vadd.f32 %v412_v42, %v323_v41  ;;  %v740_v45 = vpop.f32.mrb[1].mxu1  ;;  %v326_v46 = vpop.f32.mrb[2].mxu0 }
  0xfc   : > { %v415_v47 = vpop.f32.mrb[2].mxu1  ;;  %v721_v48 = vpop.f32.mrb[3].mxu0 }
  0xfd   : > { %v416_v49 = vadd.f32 %v415_v47, %v326_v46  ;;  %v741_v50 = vpop.f32.mrb[3].mxu1 }
 0x119   : > { %v519_v51 = vpop.f32.mrb[4].mxu0 }
 0x11a   : > { %v526_v52 = vadd.f32 %v519_v51, %v413_v44  ;;  %v760_v53 = vpop.f32.mrb[5].mxu0 }
 0x11b   : > { %v522_v55 = vpop.f32.mrb[6].mxu0 }
 0x11c   : > { %v528_v56 = vadd.f32 %v526_v52, %v894_v14  ;;  %v527_v57 = vadd.f32 %v522_v55, %v416_v49  ;;  %v761_v58 = vpop.f32.mrb[7].mxu0 }
 0x11e   : > { %v537_v59 = vadd.f32 %v670_v54, %v528_v56  ;;  %v529_v60 = vadd.f32 %v527_v57, %v897_v15 }
 0x120   : > { %539 = vst [vmem:[%s172_s22] sm:$0xff] %v537_v59  ;;  %v538_v61 = vadd.f32 %v670_v54, %v529_v60 }
 0x122   : > { %540 = vst [vmem:[%s172_s22 + $0x8] sm:$0xff] %v538_v61 }
 0x123 PF: > { %s13_s12 = sadd.s32 1, %s803_s12  }
 0x124   : > { %p10_p4 = scmp.ge.s32.totalorder %s13_s12, 4  }
 0x126   :  { %12 = sbr.rel (!%p10_p4) target bundleno = 1 (0x1), region = 64 }

</bundles_post_ra>
